<compile_context>
chip_gen: v6e
topology: v6e:2x2x1
jax: 0.10.0
libtpu: 0.0.40
codegen_flags: <defaults>
</compile_context>

<pallas_src>
import functools

import jax
import jax.numpy as jnp
from jax.experimental import pallas as pl
from jax.experimental.pallas import tpu as pltpu


def _attention_kernel(x_ref, *rest, has_mask):
    """One grid step: a block of Bb independent sequences, fully fused.

    x_ref:    (Bb, T, D)  VMEM   input features (native dtype)
    mask_ref: (Bb, T)     VMEM   dense mask (only when has_mask)
    w_ref:    (1, D)      VMEM   Linear(D, 1) weight, f32, resident
    b_ref:    (1, 1)      SMEM   Linear bias scalar, f32
    out_ref:  (Bb, D)     VMEM   attention-pooled output (native dtype)
    a_ref:    (Bb, T)     VMEM   attention weights, f32
    """
    if has_mask:
        mask_ref, w_ref, b_ref, out_ref, a_ref = rest
    else:
        w_ref, b_ref, out_ref, a_ref = rest
        mask_ref = None

    x = x_ref[...]                                   # (Bb, T, D) native dtype
    th = jnp.tanh(x)                                 # EUP; nn.Dropout is identity in eval
    # TODO(synk): nn.Dropout is a no-op in eval mode / p=0.0, so it is omitted.

    w = w_ref[...]                                   # (1, D) f32
    b = b_ref[0, 0]                                  # scalar f32 from SMEM

    # Score over D: VPU multiply (promotes to f32) + lane reduce -> dense (Bb, T).
    scores = jnp.sum(th * w, axis=-1) + b            # f32 (Bb, T)

    # Softmax over T with the mask folded into the denominator
    # (algebraically identical to softmax followed by mask renormalization).
    s_max = jnp.max(scores, axis=-1, keepdims=True)
    e = jnp.exp(scores - s_max)
    if has_mask:
        e = e * mask_ref[...].astype(jnp.float32)
    denom = jnp.sum(e, axis=-1, keepdims=True)
    # NOTE: exact reciprocal (approx=True would break the 1e-5 tolerance).
    # An all-zero mask row yields NaN, same as the PyTorch reference.
    a = e * pl.reciprocal(denom)                     # (Bb, T) f32
    a_ref[...] = a

    # Pooled output: batched (1,T)@(T,D) on the MXU, native-dtype operands,
    # f32 accumulation.
    av = a.astype(x.dtype)[:, None, :]               # (Bb, 1, T)
    pooled = jnp.einsum("bqt,btd->bqd", av, x,
                        preferred_element_type=jnp.float32)   # (Bb, 1, D) f32
    out_ref[...] = pooled[:, 0, :].astype(out_ref.dtype)


def _choose_batch_block(batch, row_bytes, target_bytes, cap_bytes):
    """Pick (Bb, B_pad): rows of x processed per grid step.

    Multi-block Bb is a multiple of 8 dividing the (at most +7 padded) batch so
    sublanes stay dense and the (8,128) rule holds; single-block uses the full
    unpadded batch. Prefers >= 2 grid steps so both v7x TensorCores get work.
    """
    row_bytes = max(int(row_bytes), 1)
    hard_cap = max(1, cap_bytes // (6 * row_bytes))      # ~6x working set per x row
    tgt = max(1, min(target_bytes // row_bytes, hard_cap))
    if batch <= 8:
        # TODO(synk): a T-tiled online-softmax path would be needed if a single
        # row's working set exceeded VMEM (very long T); not required here.
        return batch, batch
    b8 = ((batch + 7) // 8) * 8
    m = b8 // 8
    d_target = max(1, min(tgt // 8, m))
    divisors = [d for d in range(1, m + 1) if m % d == 0]
    d = max(dd for dd in divisors if dd <= d_target)
    if d == m and m >= 2:
        d = max(dd for dd in divisors if dd < m)         # force >= 2 grid steps
    return 8 * d, b8


def attention_forward(x, w, b, mask=None):
    """x: (B, T, D); w: (D,) Linear weight; b: () Linear bias; mask: optional (B, T).

    Returns (out (B, D), a (B, T, 1)) matching the PyTorch Attention.forward.
    """
    B, T, D = x.shape
    dtype = x.dtype
    itemsize = jnp.dtype(dtype).itemsize
    has_mask = mask is not None

    # Generation-aware sizing (v5e/v6e: 128 MiB physical VMEM, v7x: 64 MiB).
    try:
        info = pltpu.get_tpu_info()
        vmem_phys = int(getattr(info, "vmem_capacity_bytes", 64 << 20))
    except Exception:  # pragma: no cover - conservative fallback
        vmem_phys = 64 << 20
    target_x_bytes = (2 << 20) if vmem_phys >= (100 << 20) else (1 << 20)
    cap_bytes = min((vmem_phys * 5) // 8, 96 << 20)

    row_bytes = T * D * itemsize
    Bb, B_pad = _choose_batch_block(B, row_bytes, target_x_bytes, cap_bytes)
    n_blocks = B_pad // Bb

    mask_dtype = dtype if itemsize < 4 else jnp.float32
    mask_arr = None
    if has_mask:
        mask_arr = mask.reshape(B, T).astype(mask_dtype)

    if B_pad != B:
        # TODO(synk): the ragged tail could be handled by a second small
        # pallas_call instead of this extra HBM pass over x (pad is <= 7 rows).
        pad = B_pad - B
        x = jnp.pad(x, ((0, pad), (0, 0), (0, 0)))
        if has_mask:
            # Pad the mask with ones so padded rows stay finite.
            mask_arr = jnp.pad(mask_arr, ((0, pad), (0, 0)), constant_values=1)

    w2 = jnp.asarray(w, jnp.float32).reshape(1, D)
    b2 = jnp.asarray(b, jnp.float32).reshape(1, 1)

    # Explicit scoped-VMEM limit from the real working set (always set; the
    # default scoped limit is only 16 MiB on v5e).
    x_blk = Bb * T * D * itemsize
    vmem_est = 2 * x_blk                       # x, double-buffered
    vmem_est += x_blk                          # tanh(x) (native dtype)
    vmem_est += Bb * T * D * 4                 # f32 score product (th * w)
    vmem_est += 2 * Bb * D * itemsize          # out, double-buffered
    vmem_est += 2 * Bb * T * 4                 # a (f32), double-buffered
    if has_mask:
        vmem_est += 2 * Bb * T * jnp.dtype(mask_dtype).itemsize
    vmem_est += D * 8 + (2 << 20)              # weight + slack
    vmem_limit = int(min(max(vmem_est, 4 << 20), cap_bytes))

    in_specs = [pl.BlockSpec((Bb, T, D), lambda i: (i, 0, 0))]          # x
    operands = [x]
    if has_mask:
        in_specs.append(pl.BlockSpec((Bb, T), lambda i: (i, 0)))        # mask (dense)
        operands.append(mask_arr)
    in_specs.append(pl.BlockSpec((1, D), lambda i: (0, 0)))             # weight (resident)
    in_specs.append(pl.BlockSpec(memory_space=pltpu.MemorySpace.SMEM))  # bias scalar
    operands += [w2, b2]

    out_specs = [
        pl.BlockSpec((Bb, D), lambda i: (i, 0)),                        # pooled output
        pl.BlockSpec((Bb, T), lambda i: (i, 0)),                        # attention weights
    ]
    out_shape = (
        jax.ShapeDtypeStruct((B_pad, D), dtype),
        jax.ShapeDtypeStruct((B_pad, T), jnp.float32),
    )

    out, a = pl.pallas_call(
        functools.partial(_attention_kernel, has_mask=has_mask),
        out_shape=out_shape,
        grid_spec=pltpu.PrefetchScalarGridSpec(
            num_scalar_prefetch=0,
            grid=(n_blocks,),
            in_specs=in_specs,
            out_specs=out_specs,
        ),
        compiler_params=pltpu.CompilerParams(
            dimension_semantics=("parallel",),
            vmem_limit_bytes=vmem_limit,
        ),
    )(*operands)

    out = out[:B]
    a = a[:B].reshape(B, T, 1)
    return out, a


def _reference(x, w, b, mask=None):
    # pure-JAX reference mirroring the PyTorch forward
    a = jnp.tanh(x) @ w.reshape(-1, 1) + b        # (B, T, 1)
    a = jax.nn.softmax(a, axis=1)
    if mask is not None:
        a = a * mask[..., None].astype(jnp.float32)
        a = a / jnp.sum(a, axis=1, keepdims=True)
    out = jnp.sum(x * a, axis=1)
    return out, a


if __name__ == "__main__":
    key = jax.random.PRNGKey(0)
    kx, kw, kx2 = jax.random.split(key, 3)

    B, T, D = 2, 8, 32
    x = jax.random.normal(kx, (B, T, D), jnp.float32)
    # deterministic synthetic parameters for nn.Linear(feature_dim=D, 1)
    w = 0.1 * jax.random.normal(kw, (D,), jnp.float32)
    b = jnp.float32(0.05)
    # a mask with some padded positions (last 2 steps of batch element 1 masked)
    mask = jnp.ones((B, T), jnp.float32).at[1, T - 2:].set(0.0)

    out, a = attention_forward(x, w, b, mask)
    jax.block_until_ready((out, a))
    ref_out, ref_a = _reference(x, w, b, mask)
    assert jnp.allclose(out, ref_out, atol=1e-5, rtol=1e-5)
    assert jnp.allclose(a, ref_a, atol=1e-5, rtol=1e-5)

    # mask=None path (compiles the mask-free kernel variant)
    out2, a2 = attention_forward(x, w, b, None)
    jax.block_until_ready((out2, a2))
    ref_out2, ref_a2 = _reference(x, w, b, None)
    assert jnp.allclose(out2, ref_out2, atol=1e-5, rtol=1e-5)
    assert jnp.allclose(a2, ref_a2, atol=1e-5, rtol=1e-5)

    # multi-block path (B=16 -> two blocks of 8; exercises the parallel grid)
    B2 = 16
    x_big = jax.random.normal(kx2, (B2, T, D), jnp.float32)
    mask_big = jnp.ones((B2, T), jnp.float32).at[3, T - 3:].set(0.0).at[11, :2].set(0.0)
    out3, a3 = attention_forward(x_big, w, b, mask_big)
    jax.block_until_ready((out3, a3))
    ref_out3, ref_a3 = _reference(x_big, w, b, mask_big)
    assert jnp.allclose(out3, ref_out3, atol=1e-5, rtol=1e-5)
    assert jnp.allclose(a3, ref_a3, atol=1e-5, rtol=1e-5)

    print("KERNEL_OK")
</pallas_src>

<mosaic_0001>
module attributes {stable_mosaic.version = 11 : i64} {
  func.func @_attention_kernel(%arg0: i32, %arg1: memref<2x8x32xf32, #tpu.memory_space<vmem>>, %arg2: memref<2x8xf32, #tpu.memory_space<vmem>>, %arg3: memref<1x32xf32, #tpu.memory_space<vmem>>, %arg4: memref<1x1xf32, #tpu.memory_space<smem>>, %arg5: memref<2x32xf32, #tpu.memory_space<vmem>>, %arg6: memref<2x8xf32, #tpu.memory_space<vmem>>) attributes {dimension_semantics = [#tpu.dimension_semantics<parallel>], iteration_bounds = array<i64: 1>, scalar_prefetch = 0 : i64, scratch_operands = 0 : i64, tpu.core_type = #tpu.core_type<tc>, window_params = [{transform_indices = @transform_0, window_bounds = array<i64: 2, 8, 32>}, {transform_indices = @transform_1, window_bounds = array<i64: 2, 8>}, {pipeline_mode = #tpu.pipeline_mode<synchronous>, transform_indices = @transform_2, window_bounds = array<i64: 1, 32>}, {transform_indices = @transform_3, window_bounds = array<i64: 1, 1>}, {transform_indices = @transform_4, window_bounds = array<i64: 2, 32>}, {transform_indices = @transform_5, window_bounds = array<i64: 2, 8>}]} {
    %c0 = arith.constant 0 : index
    %c0_0 = arith.constant 0 : index
    %c0_1 = arith.constant 0 : index
    %0 = vector.load %arg1[%c0, %c0_0, %c0_1] : memref<2x8x32xf32, #tpu.memory_space<vmem>>, vector<2x8x32xf32>
    %1 = math.tanh %0 : vector<2x8x32xf32>
    %c0_2 = arith.constant 0 : index
    %c0_3 = arith.constant 0 : index
    %2 = vector.load %arg3[%c0_2, %c0_3] : memref<1x32xf32, #tpu.memory_space<vmem>>, vector<1x32xf32>
    %c0_4 = arith.constant 0 : index
    %c0_5 = arith.constant 0 : index
    %3 = memref.load %arg4[%c0_4, %c0_5] : memref<1x1xf32, #tpu.memory_space<smem>>
    %4 = vector.shape_cast %2 : vector<1x32xf32> to vector<1x1x32xf32>
    %5 = vector.broadcast %4 : vector<1x1x32xf32> to vector<2x8x32xf32>
    %6 = arith.mulf %1, %5 : vector<2x8x32xf32>
    %cst = arith.constant dense<0.000000e+00> : vector<2x8xf32>
    %7 = vector.multi_reduction <add>, %6, %cst [2] : vector<2x8x32xf32> to vector<2x8xf32>
    %8 = vector.broadcast %3 : f32 to vector<2x8xf32>
    %9 = arith.addf %7, %8 : vector<2x8xf32>
    %cst_6 = arith.constant dense<0xFF800000> : vector<2xf32>
    %10 = vector.multi_reduction <maximumf>, %9, %cst_6 [1] : vector<2x8xf32> to vector<2xf32>
    %11 = vector.shape_cast %10 : vector<2xf32> to vector<2x1xf32>
    %12 = vector.broadcast %11 : vector<2x1xf32> to vector<2x8xf32>
    %13 = arith.subf %9, %12 : vector<2x8xf32>
    %14 = math.exp %13 : vector<2x8xf32>
    %c0_7 = arith.constant 0 : index
    %c0_8 = arith.constant 0 : index
    %15 = vector.load %arg2[%c0_7, %c0_8] : memref<2x8xf32, #tpu.memory_space<vmem>>, vector<2x8xf32>
    %16 = arith.mulf %14, %15 : vector<2x8xf32>
    %cst_9 = arith.constant dense<0.000000e+00> : vector<2xf32>
    %17 = vector.multi_reduction <add>, %16, %cst_9 [1] : vector<2x8xf32> to vector<2xf32>
    %18 = vector.shape_cast %17 : vector<2xf32> to vector<2x1xf32>
    %19 = tpu.reciprocal %18 : vector<2x1xf32> -> vector<2x1xf32>
    %20 = vector.broadcast %19 : vector<2x1xf32> to vector<2x8xf32>
    %21 = arith.mulf %16, %20 : vector<2x8xf32>
    %c0_10 = arith.constant 0 : index
    %c0_11 = arith.constant 0 : index
    %22 = vector.load %arg6[%c0_10, %c0_11] : memref<2x8xf32, #tpu.memory_space<vmem>>, vector<2x8xf32>
    tpu.vector_store %arg6[%c0_10, %c0_11], %21 {strides = array<i32>} : memref<2x8xf32, #tpu.memory_space<vmem>>, vector<2x8xf32>,
    %23 = vector.shape_cast %21 : vector<2x8xf32> to vector<2x1x8xf32>
    "tpu.trace_start"() <{level = 10 : i32, message = "bqt,btd->bqd"}> : () -> ()
    %cst_12 = arith.constant dense<0.000000e+00> : vector<2x1x32xf32>
    %24 = tpu.matmul %23, %0, %cst_12 {dimension_numbers = #tpu.dot_dimension_numbers<[2], [1], [1], [2], [0, 0, 0, 1, 1, 2], [0], [0]>} : vector<2x1x8xf32>, vector<2x8x32xf32>, vector<2x1x32xf32> -> vector<2x1x32xf32>
    "tpu.trace_stop"() : () -> ()
    %25 = vector.shape_cast %24 : vector<2x1x32xf32> to vector<2x32xf32>
    %c0_13 = arith.constant 0 : index
    %c0_14 = arith.constant 0 : index
    %26 = vector.load %arg5[%c0_13, %c0_14] : memref<2x32xf32, #tpu.memory_space<vmem>>, vector<2x32xf32>
    tpu.vector_store %arg5[%c0_13, %c0_14], %25 {strides = array<i32>} : memref<2x32xf32, #tpu.memory_space<vmem>>, vector<2x32xf32>,
    return
  }
  func.func @transform_0(%arg0: i32) -> (i32, i32, i32) {
    %c0_i32 = arith.constant 0 : i32
    %c0_i32_0 = arith.constant 0 : i32
    %c0_i32_1 = arith.constant 0 : i32
    return %arg0, %c0_i32, %c0_i32_0 : i32, i32, i32
  }
  func.func @transform_1(%arg0: i32) -> (i32, i32) {
    %c0_i32 = arith.constant 0 : i32
    %c0_i32_0 = arith.constant 0 : i32
    return %arg0, %c0_i32 : i32, i32
  }
  func.func @transform_2(%arg0: i32) -> (i32, i32) {
    %c0_i32 = arith.constant 0 : i32
    %c0_i32_0 = arith.constant 0 : i32
    %c0_i32_1 = arith.constant 0 : i32
    return %c0_i32, %c0_i32_0 : i32, i32
  }
  func.func @transform_3(%arg0: i32) -> (i32, i32) {
    %c0_i32 = arith.constant 0 : i32
    %c0_i32_0 = arith.constant 0 : i32
    %c0_i32_1 = arith.constant 0 : i32
    return %c0_i32, %c0_i32_0 : i32, i32
  }
  func.func @transform_4(%arg0: i32) -> (i32, i32) {
    %c0_i32 = arith.constant 0 : i32
    %c0_i32_0 = arith.constant 0 : i32
    return %arg0, %c0_i32 : i32, i32
  }
  func.func @transform_5(%arg0: i32) -> (i32, i32) {
    %c0_i32 = arith.constant 0 : i32
    %c0_i32_0 = arith.constant 0 : i32
    return %arg0, %c0_i32 : i32, i32
  }
}

</mosaic_0001>

<bundles_post_ra>
// kernel: tpu_custom_call.1
= control target key start
LH: loop header
LB: loop body
LE: loop exit
PB: predicated region body
PF: predicated region fallthrough
CT: control target
= control target key end

     0   :  { %12 = vsyncpa [#allocation4], 0  ;;  %s533_s0 = inlined_call_operand.hbm [shape: f32[2,8,32], index: 0, kind: input, shape index: {}]   ;;  %s534_s1 = inlined_call_operand.vmem [shape: f32[2,8], index: 1, kind: input, shape index: {}]   ;;  %s535_s2 = inlined_call_operand.vmem [shape: f32[1,32], index: 2, kind: input, shape index: {}]   ;;  %s536_s3 = inlined_call_operand.<no memory space> [shape: f32[1,1], index: 3, kind: input, shape index: {}]   ;;  %s537_s4 = inlined_call_operand.hbm [shape: f32[2,32], index: 4, kind: output, shape index: {0}]   ;;  %s538_s5 = inlined_call_operand.hbm [shape: f32[2,8], index: 5, kind: output, shape index: {1}]  }
   0x1   :  { %13 = vsyncpa [#allocation5], 0 }
   0x2   :  { %14 = vsyncpa [#allocation8], 0  ;;  %s454_s18 = smov [#allocation3]  }
   0x3   :  { %s20_s19 = sshll.u32 %s454_s18, 4  ;;  %s21_s19 = int_to_ptr.vmem [resolvable:$true] %s20_s19 }
   0x4   :  { %s396_s20 = scalar_lea.vmem %s21_s19, 256  ;;  %p401_p1 = scmp.lt.s32.totalorder %s21_s19, %s21_s19 }
   0x5   :  { %p397_p0 = scmp.ne.s32.totalorder %s21_s19, %s396_s20  ;;  %p402_p2 = scmp.lt.s32.totalorder %s396_s20, %s396_s20 }
   0x7   :  { %p403_p3 = por %p402_p2, %p401_p1 }
   0x9   :  { %p404_p4 = pnand %p403_p3, %p397_p0 }
   0xb   :  { %407 = shalt.err (!%p404_p4)
}
   0xc   :  { %s455_s21 = smov 128   ;;  %s456_s22 = smov 8  }
   0xd   :  { %26 = dma.hbm_to_vmem [thread:$0]  %s533_s0, 256, %s21_s19, [#allocation4], %s455_s21, %s455_s21, %s456_s22  }
   0xe   :  { %448 = dma.done.wait [#allocation4], 256  }
   0xf   :  { %449 = vsyncadd [#allocation4], 4294967040  ;;  %v62_v0 = vlaneseq  ;;  %v497_v4 = vld [vmem:[#allocation3] sm:$0xff]  ;;  %v499_v5 = vld [vmem:[#allocation3 + $0x8] sm:$0xff]  ;;  %vm50_vm0 = vcmask 261120   ;;  %v57_v16 = vstv %s536_s3  ;;  %vm72_vm1 = vcmask 1041409  }
  0x10   :  { %378 = vtanh.f32 %v497_v4  ;;  %v351_v6 = vld [vmem:[%s535_s2] ss:$0 sm:$0xff]  ;;  %vm75_vm2 = vcmask 58368   ;;  %v457_v27 = vmov 0   ;;  %v458_v50 = vmov 0.0  }
  0x11   :  { %v63_v1 = vand.u32 127, %v62_v0  ;;  %v65_v2 = vshrl.u32 %v62_v0, 7  ;;  %380 = vtanh.f32 %v499_v5  ;;  %v96_v14 = vld [vmem:[%s534_s1] sm:$0x3]  ;;  %376 = vset.pattern.permute.xlu1 %v457_v27  ;;  %377 = vset.pattern.permute.xlu0 %v457_v27  ;;  %vm459_vm3 = vmmov 0   ;;  %s460_s1 = smov [#allocation7]  }
  0x12   :  { %363 = vmatprep.subr.mxu1 %v458_v50  ;;  %365 = vmatprep.mubr.msk.f32.mxu1 %vm459_vm3, %v458_v50  ;;  %vm170_vm4 = vcmask 64512   ;;  %s338_s2 = sshll.u32 %s460_s1, 4  ;;  %s339_s2 = int_to_ptr.vmem [resolvable:$true] %s338_s2 }
  0x13   :  { %v495_v3 = vsub.s32 %v63_v1, %v65_v2  ;;  %v86_v13 = vsub.s32 1, %v65_v2  ;;  %v82_v25 = vsub.s32 0, %v65_v2  ;;  %364 = vmatpush3.msra.mxu1 %v499_v5  ;;  %358 = vmatprep.subr.mxu0 %v458_v50  ;;  %s408_s3 = scalar_lea.vmem %s339_s2, 32  ;;  %p413_p6 = scmp.lt.s32.totalorder %s339_s2, %s339_s2 }
  0x14   :  { %359 = vmatpush3.msra.mxu0 %v497_v4  ;;  %360 = vmatprep.mubr.msk.f32.mxu0 %vm459_vm3, %v458_v50  ;;  %p409_p5 = scmp.ne.s32.totalorder %s339_s2, %s408_s3  ;;  %p414_p7 = scmp.lt.s32.totalorder %s408_s3, %s408_s3 }
  0x15   :  { %v108_v15 = vrot.slane %v96_v14, %v86_v13  ;;  %v101_v26 = vrot.slane %v96_v14, %v82_v25 }
  0x16   :  { %p415_p8 = por %p414_p7, %p413_p6 }
  0x18   :  { %p416_p9 = pnand %p415_p8, %p409_p5 }
  0x1d   :  { %v379_v7 = vpop.eup %378 }
  0x1e   :  { %v381_v8 = vpop.eup %380  ;;  %v48_v9 = vmul.f32 %v379_v7, %v351_v6 }
  0x1f   :  { %v49_v10 = vmul.f32 %v381_v8, %v351_v6 }
  0x20   :  { %v51_v11 = vsel %vm50_vm0, %v48_v9, 0.0 }
  0x21   :  { %52 = vadd.xlane.f32.xlu0 %v51_v11  ;;  %v54_v12 = vsel %vm50_vm0, %v49_v10, 0.0 }
  0x25   :  { %55 = vadd.xlane.f32.xlu0 %v54_v12 }
  0x3b   :  { %110 = vbcast.lane.b32.xlu0 %v108_v15, 256 }
  0xaa   :  { %v53_v17 = vpop.xlane.xlu0 %52 }
  0xab   :  { %v58_v18 = vadd.f32 %v57_v16, %v53_v17 }
  0xad   :  { %v67_v21 = vrot.slane %v58_v18, %v495_v3 }
  0xae   :  { %v56_v19 = vpop.xlane.xlu0 %55 }
  0xaf   :  { %v59_v20 = vadd.f32 %v57_v16, %v56_v19 }
  0xb1   :  { %v71_v22 = vrot.slane %v59_v20, %v495_v3 }
  0xb2   :  { %v111_v39 = vpop.permute.xlu0 %110 }
  0xb3   :  { %v73_v23 = vsel %vm72_vm1, %v71_v22, %v67_v21 }
  0xb4   :  { %v76_v24 = vsel %vm75_vm2, %v73_v23, -inf }
  0xb5   :  { %77 = vmax.xlane.f32.xlu1 %v76_v24 }
  0xc6   :  { %103 = vbcast.lane.b32.xlu1 %v101_v26, 256 }
 0x13e   :  { %v78_v28 = vpop.xlane.xlu1 %77 }
 0x13f   :  { %v83_v29 = vrot.slane %v78_v28, %v82_v25  ;;  %v87_v30 = vrot.slane %v78_v28, %v86_v13 }
 0x141   :  { %v90_v31 = vsub.f32 %v58_v18, %v83_v29  ;;  %v91_v32 = vsub.f32 %v59_v20, %v87_v30 }
 0x142   :  { %v104_v35 = vpop.permute.xlu1 %103 }
 0x143   :  { %v92_v33 = vmul.f32 1.442695, %v90_v31  ;;  %v94_v34 = vmul.f32 1.442695, %v91_v32 }
 0x145   :  { %382 = vpow2.f32 %v92_v33 }
 0x146   :  { %384 = vpow2.f32 %v94_v34 }
 0x152   :  { %v383_v36 = vpop.eup %382 }
 0x153   :  { %v114_v37 = vmul.f32 %v383_v36, %v104_v35  ;;  %v385_v38 = vpop.eup %384 }
 0x154   :  { %v115_v40 = vmul.f32 %v385_v38, %v111_v39 }
 0x155   :  { %119 = vperm.xlu1 %376, %v114_v37  }
 0x159   :  { %122 = vperm.xlu1 %376, %v115_v40  }
 0x1d0   :  { %v120_v41 = vpop.permute.xlu1 %119 }
 0x1d1   :  { %v127_v43 = vrot.slane %v120_v41, %v495_v3 }
 0x1d4   :  { %v123_v42 = vpop.permute.xlu1 %122 }
 0x1d5   :  { %v131_v44 = vrot.slane %v123_v42, %v495_v3 }
 0x1d7   :  { %v132_v45 = vsel %vm72_vm1, %v131_v44, %v127_v43 }
 0x1d8   :  { %v134_v46 = vsel %vm75_vm2, %v132_v45, 0.0 }
 0x1d9   :  { %135 = vadd.xlane.f32.xlu1 %v134_v46 }
 0x262   :  { %v136_v47 = vpop.xlane.xlu1 %135 }
 0x263   :  { %386 = vrcp.f32 %v136_v47 }
 0x270   :  { %v387_v48 = vpop.eup %386 }
 0x271   :  { %v146_v49 = vrot.slane %v387_v48, %v86_v13  ;;  %v142_v52 = vrot.slane %v387_v48, %v82_v25 }
 0x273   :  { %v150_v51 = vmul.f32 %v146_v49, %v115_v40  ;;  %v149_v53 = vmul.f32 %v142_v52, %v114_v37 }
 0x275   :  { %157 = vperm.xlu0 %377, %v150_v51  }
 0x279   :  { %154 = vperm.xlu0 %377, %v149_v53  }
 0x2f0   :  { %v158_v54 = vpop.permute.xlu0 %157 }
 0x2f1   :  { %v166_v55 = vrot.slane %v158_v54, %v495_v3 }
 0x2f3   :  { %366 = vmatmul.mubr.msk.f32.vlgmr.msra.gmra.mxu1 %vm170_vm4, %v166_v55 }
 0x2f4   :  { %v155_v56 = vpop.permute.xlu0 %154 }
 0x2f5   :  { %v162_v57 = vrot.slane %v155_v56, %v495_v3 }
 0x2f7   :  { %361 = vmatmul.mubr.msk.f32.vlgmr.msra.gmra.mxu0 %vm170_vm4, %v162_v57  ;;  %v167_v58 = vsel %vm72_vm1, %v166_v55, %v162_v57 }
 0x2f8   :  { %169 = vst.msk [vmem:[#allocation7] sm:$0x3] %vm75_vm2, %v167_v58 }
 0x2f9   :  { %419 = shalt.err (!%p416_p9)
}
 0x2fa   :  { %341 = dma.vmem_to_hbm [thread:$0]  %s339_s2, 32, %s538_s5, [#allocation8]   ;;  %vm320_vm5 = vcmask 254976  }
 0x2fb   :  { %s461_s7 = smov [#allocation6]  }
 0x2fc   :  { %s328_s8 = sshll.u32 %s461_s7, 4  ;;  %s329_s8 = int_to_ptr.vmem [resolvable:$true] %s328_s8 }
 0x2fd   :  { %s428_s9 = scalar_lea.vmem %s329_s8, 32  ;;  %p433_p11 = scmp.lt.s32.totalorder %s329_s8, %s329_s8 }
 0x2fe   :  { %p429_p10 = scmp.ne.s32.totalorder %s329_s8, %s428_s9  ;;  %p434_p12 = scmp.lt.s32.totalorder %s428_s9, %s428_s9 }
 0x300   :  { %p435_p13 = por %p434_p12, %p433_p11 }
 0x302   :  { %p436_p0 = pnand %p435_p13, %p429_p10 }
 0x3b3   :  { %v311_v59 = vpop.f32.mrf.mxu1 }
 0x3b4   :  { %v317_v61 = vrot.slane %v311_v59, 7 }
 0x3b5   :  { %v367_v60 = vpop.f32.mrf.mxu1 }
 0x3b7   :  { %v239_v62 = vpop.f32.mrf.mxu0 }
 0x3b8   :  { %v318_v63 = vsel %vm72_vm1, %v317_v61, %v239_v62 }
 0x3b9   :  { %v362_v0 = vpop.f32.mrf.mxu0  ;;  %321 = vst.msk [vmem:[#allocation6] sm:$0x3] %vm320_vm5, %v318_v63 }
 0x3ba   :  { %439 = shalt.err (!%p436_p0)
}
 0x3bb   :  { %331 = dma.vmem_to_hbm [thread:$0]  %s329_s8, 32, %s537_s4, [#allocation5]  }
 0x3bc   :  { %450 = dma.done.wait [#allocation5], 32  }
 0x3bd   :  { %451 = vsyncadd [#allocation5], 4294967264 }
 0x3be   :  { %452 = dma.done.wait [#allocation8], 32  }
 0x3bf   :  { %453 = vsyncadd [#allocation8], 4294967264 }
 0x3c0   :  { %348 = vsyncpa [#allocation4], 1 }
 0x3c1   :  { %349 = vsyncpa [#allocation5], 1 }
 0x3c2   :  { %350 = vsyncpa [#allocation8], 1 }

</bundles_post_ra>
